<compile_context>
chip_gen: v7x
topology: tpu7x:2x2x1
jax: 0.10.0
libtpu: 0.0.40
codegen_flags: <defaults>
</compile_context>

<pallas_src>
import functools
import math

import jax
import jax.numpy as jnp
from jax.experimental import pallas as pl
from jax.experimental.pallas import tpu as pltpu


def _round_up(n, m):
    return ((n + m - 1) // m) * m


def _pe_add_kernel(pos_ref, x_ref, div_ref, o_ref, *, batch, tile_seq):
    """Adds the on-the-fly positional encoding to one tile of x.

    pos_ref : SMEM scalar-prefetch ref, shape (1,), int32 (the `pos` offset)
    x_ref   : VMEM tile of x viewed as (seq, batch*d_model): (tile_seq, batch*d_model)
    div_ref : VMEM (1, d_model) f32 -- precomputed div_term (exp hoisted out)
    o_ref   : VMEM output tile, same shape as x_ref
    """
    i = pl.program_id(0)
    pos = pos_ref[0]

    # Sequence index of each sublane row of this tile.  The sublane axis IS
    # the sequence axis in the (seq, batch*d_model) view -> no integer divide.
    s = (jax.lax.broadcasted_iota(jnp.int32, (tile_seq, 1), 0)
         + i * tile_seq + pos).astype(jnp.float32)                   # (tile_seq, 1)

    # pe computed once per *sequence* row (deduped across batch).
    # sin(a) + cos(a) == sqrt(2) * sin(a + pi/4): one polynomial per element.
    angle = s * div_ref[...]                                          # (tile_seq, d_model)
    pe_u = (math.sqrt(2.0) * jnp.sin(angle + 0.25 * math.pi)).astype(x_ref.dtype)

    # Expand across batch along the lane axis: cheap slab copies instead of
    # batch x sin polynomials on the (already busy) VALU.
    if batch > 1:
        pe = jnp.concatenate([pe_u] * batch, axis=-1)                 # (tile_seq, batch*d_model)
    else:
        pe = pe_u

    # Add in the input dtype (bf16-native on v6e/v7x); dropout eval = identity.
    o_ref[...] = (x_ref[...] + pe).astype(o_ref.dtype)


def positional_encoding(x, pos=0, tile_seq=None):
    """x: (seq, batch, d_model); pos: python int or int32 scalar."""
    seq, batch, d_model = x.shape
    lane = batch * d_model

    # Free, layout-preserving view (merges the two trailing contiguous dims):
    # lane axis = batch*d_model (lane-dense), sublane axis = seq.
    x2 = x.reshape(seq, lane)

    itemsize = jnp.dtype(x.dtype).itemsize
    row_bytes = lane * itemsize

    if tile_seq is None:
        # ~4 MiB input tile (in+out double-buffered stays well under the
        # 48 MiB VMEM limit below), capped so the "parallel" axis has >= ~4
        # grid steps for v7x's two TensorCores when seq is large enough.
        target = max(8, (4 * 1024 * 1024) // max(1, row_bytes))
        target = min(target, max(8, pl.cdiv(seq, 4)))
    else:
        target = max(1, int(tile_seq))

    if target >= seq:
        tile_seq_v = seq                       # full-extent block: always legal
    else:
        t = _round_up(target, 8)               # (8, 128)-rule on the sublane dim
        tile_seq_v = seq if t >= seq else t

    grid = (pl.cdiv(seq, tile_seq_v),)

    pos_arr = jnp.asarray([pos], dtype=jnp.int32)
    # div_term hoisted out of the kernel (matches the module's arange(0, d_model)).
    div_term = jnp.exp(
        jnp.arange(0, d_model, dtype=jnp.float32)
        * (-math.log(10000.0) / d_model)).reshape(1, d_model)

    kernel = functools.partial(_pe_add_kernel, batch=batch, tile_seq=tile_seq_v)

    grid_spec = pltpu.PrefetchScalarGridSpec(
        num_scalar_prefetch=1,
        grid=grid,
        in_specs=[
            pl.BlockSpec((tile_seq_v, lane), lambda i, pos_ref: (i, 0)),
            pl.BlockSpec((1, d_model), lambda i, pos_ref: (0, 0)),
        ],
        out_specs=pl.BlockSpec((tile_seq_v, lane), lambda i, pos_ref: (i, 0)),
    )

    total = seq * batch * d_model
    cost = pl.CostEstimate(
        # one add per element + ~20-op sin polynomial per *unique* (seq,d) elem
        flops=2 * total + 20 * seq * d_model,
        transcendentals=seq * d_model,
        bytes_accessed=2 * x.nbytes + div_term.size * 4,
    )

    out2 = pl.pallas_call(
        kernel,
        out_shape=jax.ShapeDtypeStruct((seq, lane), x.dtype),
        grid_spec=grid_spec,
        compiler_params=pltpu.CompilerParams(
            dimension_semantics=("parallel",),
            vmem_limit_bytes=48 * 1024 * 1024,
        ),
        cost_estimate=cost,
        # x2 is operand 1 (after the scalar-prefetch pos_arr); alias it to the
        # output so XLA can donate the buffer.
        input_output_aliases={1: 0},
    )(pos_arr, x2, div_term)

    return out2.reshape(seq, batch, d_model)


def _reference(x, pos=0, max_len=5000):
    """Pure-JAX reference mirroring the PyTorch buffer construction exactly."""
    seq, _, d_model = x.shape
    position = jnp.arange(0, max_len, dtype=jnp.float32)[:, None]          # (max_len, 1)
    div_term = jnp.exp(jnp.arange(0, d_model, dtype=jnp.float32)
                       * (-math.log(10000.0) / d_model))                   # (d_model,)
    pe = jnp.sin(position * div_term) + jnp.cos(position * div_term)       # (max_len, d_model)
    pe = pe[:, None, :]                                                    # (max_len, 1, d_model)
    return x + pe[pos:pos + seq]


if __name__ == "__main__":
    key = jax.random.PRNGKey(0)

    # Small demo shape consistent with the module: (seq, batch, d_model).
    seq, batch, d_model = 8, 2, 32
    x = jax.random.normal(key, (seq, batch, d_model), dtype=jnp.float32)

    out = positional_encoding(x, pos=3)
    jax.block_until_ready(out)
    ref = _reference(x, pos=3)
    assert out.shape == (seq, batch, d_model)
    assert jnp.allclose(out, ref, atol=1e-5, rtol=1e-5), "mismatch vs reference"

    # Multi-tile / partial-last-tile path with a forced small tile:
    # seq=40, tile_seq=16 -> 3 grid steps (16 + 16 + 8).
    x2 = jax.random.normal(jax.random.PRNGKey(1), (40, 2, 128), dtype=jnp.float32)
    out2 = positional_encoding(x2, pos=7, tile_seq=16)
    jax.block_until_ready(out2)
    ref2 = _reference(x2, pos=7)
    assert jnp.allclose(out2, ref2, atol=1e-5, rtol=1e-5), "mismatch vs reference (tiled)"

    # bf16 path (pe cast once, add done in bf16).
    x3 = jax.random.normal(jax.random.PRNGKey(2), (48, 4, 128), dtype=jnp.bfloat16)
    out3 = positional_encoding(x3, pos=0)
    jax.block_until_ready(out3)
    ref3 = _reference(x3.astype(jnp.float32), pos=0)
    assert jnp.allclose(out3.astype(jnp.float32), ref3, atol=6e-2, rtol=6e-2), \
        "mismatch vs reference (bf16)"

    print("KERNEL_OK")
</pallas_src>

<mosaic_0001>
module attributes {stable_mosaic.version = 11 : i64} {
  func.func @_pe_add_kernel(%arg0: i32, %arg1: memref<1xi32, #tpu.memory_space<smem>>, %arg2: memref<8x64xf32, #tpu.memory_space<vmem>>, %arg3: memref<1x32xf32, #tpu.memory_space<vmem>>, %arg4: memref<8x64xf32, #tpu.memory_space<vmem>>) attributes {dimension_semantics = [#tpu.dimension_semantics<parallel>], iteration_bounds = array<i64: 1>, scalar_prefetch = 1 : i64, scratch_operands = 0 : i64, tpu.core_type = #tpu.core_type<tc>, window_params = [{transform_indices = @transform_0, window_bounds = array<i64: 8, 64>}, {pipeline_mode = #tpu.pipeline_mode<synchronous>, transform_indices = @transform_1, window_bounds = array<i64: 1, 32>}, {transform_indices = @transform_2, window_bounds = array<i64: 8, 64>}]} {
    %c0 = arith.constant 0 : index
    %0 = memref.load %arg1[%c0] : memref<1xi32, #tpu.memory_space<smem>>
    %1 = tpu.iota {dimensions = array<i32: 0>} : vector<8x1xi32>
    %c8_i32 = arith.constant 8 : i32
    %2 = arith.muli %arg0, %c8_i32 : i32
    %3 = vector.broadcast %2 : i32 to vector<8x1xi32>
    %4 = arith.addi %1, %3 : vector<8x1xi32>
    %5 = vector.broadcast %0 : i32 to vector<8x1xi32>
    %6 = arith.addi %4, %5 : vector<8x1xi32>
    %7 = arith.sitofp %6 : vector<8x1xi32> to vector<8x1xf32>
    %c0_0 = arith.constant 0 : index
    %c0_1 = arith.constant 0 : index
    %8 = vector.load %arg3[%c0_0, %c0_1] : memref<1x32xf32, #tpu.memory_space<vmem>>, vector<1x32xf32>
    %9 = vector.broadcast %7 : vector<8x1xf32> to vector<8x32xf32>
    %10 = vector.broadcast %8 : vector<1x32xf32> to vector<8x32xf32>
    %11 = arith.mulf %9, %10 : vector<8x32xf32>
    %cst = arith.constant 0.785398185 : f32
    %12 = vector.broadcast %cst : f32 to vector<8x32xf32>
    %13 = arith.addf %11, %12 : vector<8x32xf32>
    %14 = math.sin %13 : vector<8x32xf32>
    %cst_2 = arith.constant 1.41421354 : f32
    %15 = vector.broadcast %cst_2 : f32 to vector<8x32xf32>
    %16 = arith.mulf %15, %14 : vector<8x32xf32>
    %17 = tpu.concatenate %16, %16 in 1 : vector<8x32xf32>, vector<8x32xf32> -> vector<8x64xf32>
    %c0_3 = arith.constant 0 : index
    %c0_4 = arith.constant 0 : index
    %18 = vector.load %arg2[%c0_3, %c0_4] : memref<8x64xf32, #tpu.memory_space<vmem>>, vector<8x64xf32>
    %19 = arith.addf %18, %17 : vector<8x64xf32>
    %c0_5 = arith.constant 0 : index
    %c0_6 = arith.constant 0 : index
    %20 = vector.load %arg4[%c0_5, %c0_6] : memref<8x64xf32, #tpu.memory_space<vmem>>, vector<8x64xf32>
    tpu.vector_store %arg4[%c0_5, %c0_6], %19 {strides = array<i32>} : memref<8x64xf32, #tpu.memory_space<vmem>>, vector<8x64xf32>,
    return
  }
  func.func @transform_0(%arg0: i32, %arg1: memref<1xi32, #tpu.memory_space<smem>>) -> (i32, i32) {
    %c0_i32 = arith.constant 0 : i32
    %c0_i32_0 = arith.constant 0 : i32
    return %arg0, %c0_i32 : i32, i32
  }
  func.func @transform_1(%arg0: i32, %arg1: memref<1xi32, #tpu.memory_space<smem>>) -> (i32, i32) {
    %c0_i32 = arith.constant 0 : i32
    %c0_i32_0 = arith.constant 0 : i32
    %c0_i32_1 = arith.constant 0 : i32
    return %c0_i32, %c0_i32_0 : i32, i32
  }
  func.func @transform_2(%arg0: i32, %arg1: memref<1xi32, #tpu.memory_space<smem>>) -> (i32, i32) {
    %c0_i32 = arith.constant 0 : i32
    %c0_i32_0 = arith.constant 0 : i32
    return %arg0, %c0_i32 : i32, i32
  }
}

</mosaic_0001>

<bundles_post_ra>
// kernel: tpu_custom_call.1
= control target key start
LH: loop header
LB: loop body
LE: loop exit
PB: predicated region body
PF: predicated region fallthrough
CT: control target
= control target key end

     0   :  { %9 = vsyncpa [#allocation5], 0  ;;  %s324_s0 = inlined_call_operand.<no memory space> [shape: s32[1], index: 0, kind: input, shape index: {}]   ;;  %s325_s1 = inlined_call_operand.hbm [shape: f32[8,64], index: 1, kind: input, shape index: {}, may-alias: {1,3}]   ;;  %s326_s2 = inlined_call_operand.vmem [shape: f32[1,32], index: 2, kind: input, shape index: {}]   ;;  %s327_s3 = inlined_call_operand.hbm [shape: f32[8,64], index: 3, kind: output, shape index: {}, may-alias: {1,3}]  }
   0x1   :  { %10 = vsyncpa [#allocation6], 0  ;;  %s244_s12 = smov [#allocation4]   ;;  %s196_s16 = scalar_lea.hbm %s325_s1, 128 }
   0x2   :  { %s17_s13 = sshll.u32 %s244_s12, 4  ;;  %p197_p0 = scmp.ne.s32.totalorder %s325_s1, %s196_s16  ;;  %s18_s13 = int_to_ptr.vmem [resolvable:$true] %s17_s13 }
   0x3   :  { %p200_p1 = scmp.lt.u32.totalorder %s196_s16, %s325_s1 }
   0x5   :  { %p202_p2 = pnand %p200_p1, %p197_p0 }
   0x7   :  { %205 = shalt.err (!%p202_p2)
}
   0x8   :  { %s206_s21 = scalar_lea.vmem %s18_s13, 128  ;;  %p211_p4 = scmp.lt.s32.totalorder %s18_s13, %s18_s13 }
   0x9   :  { %p207_p3 = scmp.ne.s32.totalorder %s18_s13, %s206_s21  ;;  %p212_p5 = scmp.lt.s32.totalorder %s206_s21, %s206_s21 }
   0xb   :  { %p213_p6 = por %p212_p5, %p211_p4 }
   0xd   :  { %p214_p7 = pnand %p213_p6, %p207_p3 }
   0xf   :  { %217 = shalt.err (!%p214_p7)
}
  0x10   :  { %20 = dma.hbm_to_vmem [thread:$0]  %s325_s1, 128, %s18_s13, [#allocation5]  }
  0x11   :  { %240 = dma.done.wait [#allocation5], 128  }
  0x12   :  { %241 = vsyncadd [#allocation5], 4294967168  ;;  %v27_v0 = vlaneseq  ;;  %v32_v1 = vstv %s324_s0  ;;  %v174_v5 = vld [vmem:[%s326_s2] ss:$0 sm:$0xff]  ;;  %v245_v19 = vmov 683565275  }
  0x13   :  { %v246_v21 = vmov 2475754826   ;;  %v247_v23 = vmov 2131351028   ;;  %v248_v25 = vmov 2102212464  }
  0x14   :  { %v28_v2 = vshrl.u32 %v27_v0, 7  ;;  %v249_v27 = vmov 920167782   ;;  %v250_v34 = vmov 1326507024   ;;  %s251_s0 = smov 32  }
  0x15   :  { %vm153_vm13 = vcmask 261120   ;;  %s252_s1 = smov [#allocation7]   ;;  %vm157_vm14 = vcmask 523264  }
  0x16   :  { %v33_v3 = vadd.s32 %v32_v1, %v28_v2  ;;  %s165_s2 = sshll.u32 %s252_s1, 4  ;;  %s166_s2 = int_to_ptr.vmem [resolvable:$true] %s165_s2 }
  0x17   :  { %s218_s28 = scalar_lea.vmem %s166_s2, 128  ;;  %p223_p9 = scmp.lt.s32.totalorder %s166_s2, %s166_s2 }
  0x18   :  { %v34_v4 = vcvt.s32.f32 %v33_v3  ;;  %p219_p8 = scmp.ne.s32.totalorder %s166_s2, %s218_s28  ;;  %p224_p10 = scmp.lt.s32.totalorder %s218_s28, %s218_s28 }
  0x1a   :  { %v42_v6 = vmul.f32 %v174_v5, %v34_v4  ;;  %p225_p11 = por %p224_p10, %p223_p9 }
  0x1c   :  { %v291_v7 = vadd.f32 0.7853982, %v42_v6  ;;  %p226_p12 = pnand %p225_p11, %p219_p8 }
  0x1e   :  { %v47_v8 = vand.u32 2139095040, %v291_v7  ;;  %v44_v10 = vand.u32 2147483647, %v291_v7  ;;  %vm46_vm7 = vcmp.lt.s32.totalorder %v291_v7, 0  ;;  %vm136_vm12 = vweird.f32 %v291_v7 }
  0x20   :  { %v48_v9 = vshrl.u32 %v47_v8, 23  ;;  %v51_v13 = vand.u32 8388607, %v44_v10  ;;  %vm45_vm8 = vcmp.le.f32.partialorder %v44_v10, 0.7853982 }
  0x22   :  { %v175_v11 = vadd.s32 4294967169, %v48_v9  ;;  %v52_v16 = vor.u32 8388608, %v51_v13 }
  0x24   :  { %v54_v12 = vadd.s32 1, %v175_v11  ;;  %v92_v36 = vshll.u32 %v52_v16, 8 }
  0x26   :  { %vm55_vm0 = vcmp.gt.s32.totalorder %v54_v12, 0 }
  0x27   :  { %v56_v14 = vsel %vm55_vm0, %v54_v12, 0 }
  0x28   :  { %v58_v15 = vand.u32 31, %v56_v14  ;;  %v57_v17 = vshrl.u32 %v56_v14, 5 }
  0x2a   :  { %v59_v18 = vsub.s32 32, %v58_v15  ;;  %v61_v20 = vshll.u32 %v245_v19, %v58_v15  ;;  %v64_v22 = vshll.u32 %v246_v21, %v58_v15  ;;  %v67_v24 = vshll.u32 %v247_v23, %v58_v15 }
  0x2b   :  { %v70_v26 = vshll.u32 %v248_v25, %v58_v15  ;;  %v73_v28 = vshll.u32 %v249_v27, %v58_v15  ;;  %vm76_vm1 = vcmp.lt.s32.totalorder %v57_v17, 1  ;;  %vm79_vm2 = vcmp.lt.s32.totalorder %v57_v17, 4 }
  0x2c   :  { %v60_v29 = vshrl.u32 %v245_v19, %v59_v18  ;;  %v62_v30 = vshrl.u32 %v246_v21, %v59_v18  ;;  %v65_v31 = vshrl.u32 %v247_v23, %v59_v18  ;;  %v68_v32 = vshrl.u32 %v248_v25, %v59_v18 }
  0x2d   :  { %v71_v33 = vshrl.u32 %v249_v27, %v59_v18  ;;  %v74_v35 = vshrl.u32 %v250_v34, %v59_v18  ;;  %vm77_vm3 = vcmp.lt.s32.totalorder %v57_v17, 2  ;;  %vm78_vm4 = vcmp.lt.s32.totalorder %v57_v17, 3 }
  0x2e   :  { %v63_v37 = vor.u32 %v62_v30, %v61_v20  ;;  %v66_v38 = vor.u32 %v65_v31, %v64_v22  ;;  %v69_v39 = vor.u32 %v68_v32, %v67_v24 }
  0x2f   :  { %v72_v40 = vor.u32 %v71_v33, %v70_v26  ;;  %v75_v41 = vor.u32 %v74_v35, %v73_v28 }
  0x30   :  { %v80_v42 = vsel %vm76_vm1, %v60_v29, %v63_v37  ;;  %v81_v43 = vsel %vm79_vm2, %v69_v39, 2102212464  ;;  %v84_v44 = vsel %vm76_vm1, %v63_v37, %v66_v38  ;;  %v88_v45 = vsel %vm76_vm1, %v66_v38, %v69_v39  ;;  %v155_v37 = vld [vmem:[#allocation4] sm:$0xff] }
  0x31   :  { %v82_v46 = vsel %vm78_vm4, %v66_v38, %v81_v43  ;;  %v85_v47 = vsel %vm79_vm2, %v72_v40, 920167782  ;;  %v89_v48 = vsel %vm79_vm2, %v75_v41, 1326507024 }
  0x32   :  { %v86_v49 = vsel %vm78_vm4, %v69_v39, %v85_v47  ;;  %v90_v50 = vsel %vm78_vm4, %v72_v40, %v89_v48  ;;  %v83_v51 = vsel %vm77_vm3, %v80_v42, %v82_v46 }
  0x33   :  { %v87_v52 = vsel %vm77_vm3, %v84_v44, %v86_v49  ;;  %v91_v53 = vsel %vm77_vm3, %v88_v45, %v90_v50  ;;  %v99_v58 = vmul.u32 %v92_v36, %v83_v51 }
  0x34   :  { %v297_v54 = vmul.u32.u64.low %v92_v36, %v91_v53  ;;  %v298_v55 = vmul.u32.u64.high %v92_v36, %v91_v53, %v297_v54  ;;  %v300_v56 = vmul.u32.u64.low %v92_v36, %v87_v52  ;;  %v301_v57 = vmul.u32.u64.high %v92_v36, %v87_v52, %v300_v56 }
  0x36   :  { %vm101_vm5 = vc.u32 %v298_v55, %v300_v56  ;;  %v102_v59 = vadd.s32 1, %v301_v57  ;;  %v100_v6 = vadd.s32 %v300_v56, %v298_v55 }
  0x38   :  { %v103_v60 = vsel %vm101_vm5, %v102_v59, %v301_v57 }
  0x39   :  { %v104_v61 = vadd.s32 %v103_v60, %v99_v58 }
  0x3b   :  { %v105_v62 = vadd.s32 536870912, %v104_v61 }
  0x3d   :  { %v106_v63 = vshrl.u32 %v105_v62, 30 }
  0x3f   :  { %v107_v0 = vshll.u32 %v106_v63, 30  ;;  %v130_v20 = vsub.s32 4, %v106_v63 }
  0x41   :  { %v108_v1 = vsub.s32 %v104_v61, %v107_v0  ;;  %v131_v23 = vsel %vm46_vm7, %v130_v20, %v106_v63 }
  0x42   :  { %v133_v26 = vsel %vm45_vm8, 0, %v131_v23 }
  0x43   :  { %v110_v2 = vsub.s32 0, %v108_v1  ;;  %v137_v27 = vadd.s32 3, %v133_v26 }
  0x45   :  { %v176_v3 = vmin.u32 %v110_v2, %v108_v1  ;;  %v138_v28 = vand.u32 3, %v137_v27 }
  0x47   :  { %v112_v4 = vclz %v176_v3  ;;  %vm143_vm9 = vcmp.eq.s32.totalorder %v138_v28, 2  ;;  %vm140_vm10 = vcmp.eq.s32.totalorder %v138_v28, 0  ;;  %vm139_vm11 = vcmp.lt.s32.totalorder %v138_v28, 2 }
  0x49   :  { %v177_v5 = vadd.s32 4294967294, %v112_v4 }
  0x4b   :  { %vm178_vm6 = vcmp.lt.s32.totalorder %v177_v5, 0 }
  0x4c   :  { %v115_v8 = vsel %vm178_vm6, 0, %v177_v5 }
  0x4d   :  { %v116_v9 = vsub.s32 32, %v115_v8  ;;  %v117_v11 = vshll.u32 %v108_v1, %v115_v8  ;;  %v120_v12 = vsub.s32 4294967266, %v115_v8 }
  0x4f   :  { %v118_v13 = vshrl.u32 %v100_v6, %v116_v9  ;;  %v121_v14 = vadd.s32 127, %v120_v12 }
  0x51   :  { %v119_v15 = vor.u32 %v118_v13, %v117_v11  ;;  %v122_v16 = vshll.u32 %v121_v14, 23 }
  0x53   :  { %v123_v17 = vor.u32 4788187, %v122_v16  ;;  %v126_v18 = vcvt.s32.f32 %v119_v15 }
  0x55   :  { %v124_v19 = vand.u32 2147483647, %v123_v17 }
  0x57   :  { %v127_v21 = vmul.f32 %v126_v18, %v124_v19 }
  0x59   :  { %v128_v22 = vxor.u32 2147483648, %v127_v21 }
  0x5b   :  { %v129_v24 = vsel %vm46_vm7, %v128_v22, %v127_v21 }
  0x5c   :  { %v132_v25 = vsel %vm45_vm8, %v291_v7, %v129_v24 }
  0x5d   :  { %192 = vcosq.f32 %v132_v25 }
  0x5e   :  { %194 = vsinq.f32 %v132_v25 }
  0x67   :  { %v193_v29 = vpop.eup %192 }
  0x68   :  { %v195_v30 = vpop.eup %194  ;;  %v144_v31 = vxor.u32 2147483648, %v193_v29 }
  0x69   :  { %v141_v32 = vxor.u32 2147483648, %v195_v30 }
  0x6a   :  { %v145_v10 = vsel %vm143_vm9, %v144_v31, %v195_v30 }
  0x6b   :  { %v142_v33 = vsel %vm140_vm10, %v193_v29, %v141_v32 }
  0x6c   :  { %v146_v34 = vsel %vm139_vm11, %v142_v33, %v145_v10 }
  0x6d   :  { %v147_v35 = vsel %vm136_vm12, nan, %v146_v34 }
  0x6e   :  { %v148_v36 = vmul.f32 1.4142135, %v147_v35 }
  0x70   :  { %150 = vrot.lane.b32.xlu0 %v148_v36, %s251_s0 }
  0xe2   :  { %v151_v38 = vpop.permute.xlu0 %150 }
  0xe3   :  { %v154_v39 = vsel %vm153_vm13, %v148_v36, %v151_v38 }
  0xe4   :  { %v156_v40 = vadd.f32 %v155_v37, %v154_v39 }
  0xe6   :  { %158 = vst.msk [vmem:[#allocation7] sm:$0xff] %vm157_vm14, %v156_v40 }
  0xe7   :  { %229 = shalt.err (!%p226_p12)
}
  0xe8   :  { %s230_s4 = scalar_lea.hbm %s327_s3, 128 }
  0xe9   :  { %p231_p13 = scmp.ne.s32.totalorder %s327_s3, %s230_s4  ;;  %p234_p0 = scmp.lt.u32.totalorder %s230_s4, %s327_s3 }
  0xeb   :  { %p236_p1 = pnand %p234_p0, %p231_p13 }
  0xed   :  { %239 = shalt.err (!%p236_p1)
}
  0xee   :  { %168 = dma.vmem_to_hbm [thread:$0]  %s166_s2, 128, %s327_s3, [#allocation6]  }
  0xef   :  { %242 = dma.done.wait [#allocation6], 128  }
  0xf0   :  { %243 = vsyncadd [#allocation6], 4294967168 }
  0xf1   :  { %172 = vsyncpa [#allocation5], 1 }
  0xf2   :  { %173 = vsyncpa [#allocation6], 1 }

</bundles_post_ra>
